<compile_context>
chip_gen: v5e
topology: v5e:2x2
jax: 0.10.0
libtpu: 0.0.40
codegen_flags: <defaults>
</compile_context>

<pallas_src>
import math

import jax
import jax.numpy as jnp
from jax.experimental import pallas as pl
from jax.experimental.pallas import tpu as pltpu


_SQRT_2_OVER_PI = math.sqrt(2.0 / math.pi)


def _round_up(x, m):
    return (x + m - 1) // m * m


def _gelu_tanh(x):
    # tanh approximation of GELU (EUP/VPU friendly, guaranteed Mosaic lowering).
    # TODO(synk): torch.nn.GELU() default is the exact erf form; the tanh
    # approximation differs by <~1e-3 abs.  Reference check uses the same form.
    return 0.5 * x * (1.0 + jnp.tanh(_SQRT_2_OVER_PI * (x + 0.044715 * (x * x * x))))


def _ffn_kernel(x_ref, w1_ref, b1_ref, w2_ref, b2_ref, o_ref, acc_ref):
    # Grid: (token tile i, hidden chunk k).
    # x_ref: (TM, Dp)   w1_ref: (Dp, TH)   b1_ref: (1, TH)
    # w2_ref: (TH, Cp)  b2_ref: (1, Cp)    o_ref: (TM, Cp)   acc_ref: (TM, Cp) f32
    k = pl.program_id(1)

    @pl.when(k == 0)
    def _():
        acc_ref[...] = jnp.zeros_like(acc_ref)

    # bf16 operands into the MXU (default param_dtype), f32 accumulation.
    x = x_ref[...].astype(w1_ref.dtype)
    h = jnp.dot(x, w1_ref[...], preferred_element_type=jnp.float32)
    h = h + b1_ref[...].astype(jnp.float32)
    h = _gelu_tanh(h)                                    # f32 math (v5e-safe)
    acc_ref[...] += jnp.dot(h.astype(w2_ref.dtype), w2_ref[...],
                            preferred_element_type=jnp.float32)

    @pl.when(k == pl.num_programs(1) - 1)
    def _():
        o_ref[...] = (acc_ref[...] + b2_ref[...].astype(jnp.float32)
                      ).astype(o_ref.dtype)


def _vmem_capacity_bytes():
    """Queried per-core VMEM capacity with a conservative (v7x-sized) fallback."""
    try:
        cap = getattr(pltpu.get_tpu_info(), "vmem_capacity_bytes", None)
        if cap:
            return int(cap)
    except Exception:
        pass
    return 64 * 1024 * 1024


def ffn_pallas(x2d, w1p, b1p, w2p, b2p, out_dim, *, tm=256, th=None,
               out_dtype=None):
    """Fused (M, D) -> (M, out_dim) FFN.  Weight/bias inputs are pre-padded."""
    M, D = x2d.shape
    d_pad, h_pad = w1p.shape
    c_pad = w2p.shape[1]
    out_dtype = out_dtype if out_dtype is not None else x2d.dtype

    x_item = x2d.dtype.itemsize
    w_item = w1p.dtype.itemsize
    b_item = b1p.dtype.itemsize
    o_item = jnp.dtype(out_dtype).itemsize

    # --- token-tile size: MXU-aligned (256 on v6e/v7x, 128 on v5e), never
    #     larger than the (sublane-rounded) problem.
    sub = 16 if x2d.dtype == jnp.bfloat16 else 8
    tm = min(tm, _round_up(M, sub))
    if tm >= 256:
        tm = (tm // 256) * 256
    elif tm >= 128:
        tm = (tm // 128) * 128
    else:
        tm = _round_up(tm, sub)
    tm = max(tm, sub)
    m_pad = _round_up(M, tm)

    # --- VMEM footprint model (Pallas double-buffers every pipelined block).
    def footprint(th_):
        dbl = 2
        return (dbl * tm * d_pad * x_item            # x tiles
                + dbl * d_pad * th_ * w_item         # W1 chunks
                + dbl * th_ * b_item                 # b1 chunks
                + dbl * th_ * c_pad * w_item         # W2 chunks
                + dbl * c_pad * b_item               # b2
                + dbl * tm * c_pad * o_item          # out tiles
                + tm * c_pad * 4                     # f32 accumulator scratch
                + tm * th_ * 4                       # f32 h temp
                + tm * th_ * w_item                  # bf16 h temp
                + tm * d_pad * w_item)               # bf16 x temp

    vmem_cap = _vmem_capacity_bytes()
    budget = int(vmem_cap * 0.70)                    # ~30% headroom (v7x-safe)

    # --- hidden-chunk size: largest 128-multiple divisor of h_pad that fits
    #     the budget (and an optional user cap).  th == h_pad ==> weights stay
    #     VMEM-resident across the whole call.
    n_chunks = h_pad // 128
    th_cap = h_pad if th is None else max(128, min(th, h_pad))
    th_sel = 128
    for g in range(n_chunks, 0, -1):
        cand = g * 128
        if n_chunks % g == 0 and cand <= th_cap and footprint(cand) <= budget:
            th_sel = cand
            break
    th = th_sel

    if m_pad != M or d_pad != D:
        x2d = jnp.pad(x2d, ((0, m_pad - M), (0, d_pad - D)))

    grid_m = m_pad // tm
    grid_k = h_pad // th
    grid = (grid_m, grid_k)

    est = footprint(th)
    vmem_limit = max(est + (4 << 20), 32 << 20)
    vmem_limit = int(min(vmem_limit, int(vmem_cap * 0.9)))

    # Advisory cost for XLA's scheduler around this custom call.
    w_bytes = (d_pad * h_pad + h_pad * c_pad) * w_item
    stream = grid_m if grid_k > 1 else 1             # weights re-streamed per M tile
    cost = pl.CostEstimate(
        flops=2 * m_pad * (d_pad * h_pad + h_pad * c_pad),
        transcendentals=m_pad * h_pad,
        bytes_accessed=(m_pad * d_pad * x_item + m_pad * c_pad * o_item
                        + stream * (w_bytes + (h_pad + c_pad) * b_item)),
    )

    y = pl.pallas_call(
        _ffn_kernel,
        out_shape=jax.ShapeDtypeStruct((m_pad, c_pad), out_dtype),
        grid_spec=pltpu.PrefetchScalarGridSpec(
            num_scalar_prefetch=0,
            grid=grid,
            in_specs=[
                pl.BlockSpec((tm, d_pad), lambda i, k: (i, 0)),   # x tile
                pl.BlockSpec((d_pad, th), lambda i, k: (0, k)),   # W1 chunk
                pl.BlockSpec((1, th), lambda i, k: (0, k)),       # b1 chunk
                pl.BlockSpec((th, c_pad), lambda i, k: (k, 0)),   # W2 chunk
                pl.BlockSpec((1, c_pad), lambda i, k: (0, 0)),    # b2
            ],
            out_specs=pl.BlockSpec((tm, c_pad), lambda i, k: (i, 0)),
            scratch_shapes=[pltpu.VMEM((tm, c_pad), jnp.float32)],
        ),
        compiler_params=pltpu.CompilerParams(
            dimension_semantics=("parallel", "arbitrary"),
            vmem_limit_bytes=vmem_limit),
        cost_estimate=cost,
    )(x2d, w1p, b1p, w2p, b2p)

    return y[:M, :out_dim]


class FeedForwardPallas:
    """JAX/Pallas equivalent of the PyTorch FeedForward module (inference mode)."""

    def __init__(self, dim, hidden_dim, dropout, out_dim=None, *,
                 key, param_dtype=jnp.bfloat16, tm=256, th=None):
        if out_dim is None:
            out_dim = dim
        self.dim = dim
        self.hidden_dim = hidden_dim
        self.out_dim = out_dim
        self.dropout = dropout   # identity at inference
        self.param_dtype = param_dtype
        self.tm = tm
        self.th = th

        k1, k2, k3, k4 = jax.random.split(key, 4)
        # PyTorch nn.Linear default init: U(-1/sqrt(fan_in), 1/sqrt(fan_in)).
        b1_bound = 1.0 / math.sqrt(dim)
        b2_bound = 1.0 / math.sqrt(hidden_dim)
        # Stored as (in, out) so the kernel computes x @ W.  Master copies in f32.
        self.w1 = jax.random.uniform(k1, (dim, hidden_dim), jnp.float32,
                                     -b1_bound, b1_bound)
        self.b1 = jax.random.uniform(k2, (hidden_dim,), jnp.float32,
                                     -b1_bound, b1_bound)
        self.w2 = jax.random.uniform(k3, (hidden_dim, out_dim), jnp.float32,
                                     -b2_bound, b2_bound)
        self.b2 = jax.random.uniform(k4, (out_dim,), jnp.float32,
                                     -b2_bound, b2_bound)

        # Pre-pad parameters once to lane-dense (multiple-of-128) feature dims.
        # Weights in param_dtype (bf16 default: half HBM/VMEM, native MXU rate);
        # biases stay f32 (added on the f32 accumulator).
        # TODO(synk): optional fp8 weight storage + per-channel scales on v7x.
        dp = _round_up(dim, 128)
        hp = _round_up(hidden_dim, 128)
        cp = _round_up(out_dim, 128)
        self.w1p = jnp.pad(self.w1, ((0, dp - dim), (0, hp - hidden_dim))).astype(param_dtype)
        self.b1p = jnp.pad(self.b1, ((0, hp - hidden_dim),)).reshape(1, hp)
        self.w2p = jnp.pad(self.w2, ((0, hp - hidden_dim), (0, cp - out_dim))).astype(param_dtype)
        self.b2p = jnp.pad(self.b2, ((0, cp - out_dim),)).reshape(1, cp)

    @property
    def unwrapped(self):
        return self

    def __call__(self, x):
        # x: (..., dim).  Dropout is identity at inference.
        # TODO(synk): training-mode stochastic dropout (pltpu.prng_*) not implemented.
        lead = x.shape[:-1]
        x2d = x.reshape(-1, self.dim)
        y2d = ffn_pallas(x2d, self.w1p, self.b1p, self.w2p, self.b2p,
                         self.out_dim, tm=self.tm, th=self.th, out_dtype=x.dtype)
        return y2d.reshape(*lead, self.out_dim)


if __name__ == "__main__":
    key = jax.random.PRNGKey(0)
    k_param, k_x = jax.random.split(key)

    # Small shapes consistent with the module.
    B, N = 2, 64              # 128 tokens total
    dim, hidden_dim = 64, 256
    dropout = 0.1             # inactive (inference forward)

    # tm=64, th=128 so the tiny demo still exercises BOTH grid axes
    # (2 token tiles x 2 hidden chunks with accumulation).
    ffn = FeedForwardPallas(dim, hidden_dim, dropout, key=k_param, tm=64, th=128)

    x = jax.random.normal(k_x, (B, N, dim), dtype=jnp.float32)
    out = jax.block_until_ready(ffn(x))

    # Plain-JAX reference with the same bf16-operand / f32-accumulate numerics
    # and the same tanh-GELU formulation.
    pd = ffn.param_dtype
    x2d = x.reshape(-1, dim).astype(pd)
    h = jnp.dot(x2d, ffn.w1.astype(pd), preferred_element_type=jnp.float32) + ffn.b1
    h = _gelu_tanh(h)
    y = jnp.dot(h.astype(pd), ffn.w2.astype(pd),
                preferred_element_type=jnp.float32) + ffn.b2
    ref = y.reshape(B, N, dim).astype(x.dtype)

    assert out.shape == (B, N, dim), out.shape
    err = float(jnp.max(jnp.abs(out - ref)))
    assert jnp.allclose(out, ref, atol=2e-3, rtol=2e-3), err

    print("KERNEL_OK")
</pallas_src>

<mosaic_0001>
module attributes {stable_mosaic.version = 11 : i64} {
  func.func @_ffn_kernel(%arg0: i32, %arg1: i32, %arg2: memref<64x128xf32, #tpu.memory_space<vmem>>, %arg3: memref<128x128xbf16, #tpu.memory_space<vmem>>, %arg4: memref<1x128xf32, #tpu.memory_space<vmem>>, %arg5: memref<128x128xbf16, #tpu.memory_space<vmem>>, %arg6: memref<1x128xf32, #tpu.memory_space<vmem>>, %arg7: memref<64x128xf32, #tpu.memory_space<vmem>>, %arg8: memref<64x128xf32, #tpu.memory_space<vmem>>) attributes {dimension_semantics = [#tpu.dimension_semantics<parallel>, #tpu.dimension_semantics<arbitrary>], iteration_bounds = array<i64: 2, 2>, scalar_prefetch = 0 : i64, scratch_operands = 1 : i64, tpu.core_type = #tpu.core_type<tc>, window_params = [{transform_indices = @transform_0, window_bounds = array<i64: 64, 128>}, {transform_indices = @transform_1, window_bounds = array<i64: 128, 128>}, {transform_indices = @transform_2, window_bounds = array<i64: 1, 128>}, {transform_indices = @transform_3, window_bounds = array<i64: 128, 128>}, {pipeline_mode = #tpu.pipeline_mode<synchronous>, transform_indices = @transform_4, window_bounds = array<i64: 1, 128>}, {transform_indices = @transform_5, window_bounds = array<i64: 64, 128>}]} {
    %c0_i32 = arith.constant 0 : i32
    %0 = arith.cmpi eq, %arg1, %c0_i32 : i32
    %1 = arith.extui %0 : i1 to i32
    %c0_i32_0 = arith.constant 0 : i32
    %2 = arith.cmpi ne, %1, %c0_i32_0 : i32
    scf.if %2 {
      %cst_18 = arith.constant 0.000000e+00 : f32
      %32 = vector.broadcast %cst_18 : f32 to vector<64x128xf32>
      %c0_19 = arith.constant 0 : index
      %c0_20 = arith.constant 0 : index
      %33 = vector.load %arg8[%c0_19, %c0_20] : memref<64x128xf32, #tpu.memory_space<vmem>>, vector<64x128xf32>
      tpu.vector_store %arg8[%c0_19, %c0_20], %32 {strides = array<i32>} : memref<64x128xf32, #tpu.memory_space<vmem>>, vector<64x128xf32>,
    } else {
    }
    %c0 = arith.constant 0 : index
    %c0_1 = arith.constant 0 : index
    %3 = vector.load %arg2[%c0, %c0_1] : memref<64x128xf32, #tpu.memory_space<vmem>>, vector<64x128xf32>
    %4 = arith.truncf %3 : vector<64x128xf32> to vector<64x128xbf16>
    %c0_2 = arith.constant 0 : index
    %c0_3 = arith.constant 0 : index
    %5 = vector.load %arg3[%c0_2, %c0_3] : memref<128x128xbf16, #tpu.memory_space<vmem>>, vector<128x128xbf16>
    %cst = arith.constant dense<0.000000e+00> : vector<64x128xf32>
    %6 = tpu.matmul %4, %5, %cst {dimension_numbers = #tpu.dot_dimension_numbers<[1], [0], [0], [1], [0, 0, 1, 1], [], []>} : vector<64x128xbf16>, vector<128x128xbf16>, vector<64x128xf32> -> vector<64x128xf32>
    %c0_4 = arith.constant 0 : index
    %c0_5 = arith.constant 0 : index
    %7 = vector.load %arg4[%c0_4, %c0_5] : memref<1x128xf32, #tpu.memory_space<vmem>>, vector<1x128xf32>
    %8 = vector.broadcast %7 : vector<1x128xf32> to vector<64x128xf32>
    %9 = arith.addf %6, %8 : vector<64x128xf32>
    %cst_6 = arith.constant 5.000000e-01 : f32
    %10 = vector.broadcast %cst_6 : f32 to vector<64x128xf32>
    %11 = arith.mulf %10, %9 : vector<64x128xf32>
    %12 = arith.mulf %9, %9 : vector<64x128xf32>
    %13 = arith.mulf %12, %9 : vector<64x128xf32>
    %cst_7 = arith.constant 4.471500e-02 : f32
    %14 = vector.broadcast %cst_7 : f32 to vector<64x128xf32>
    %15 = arith.mulf %14, %13 : vector<64x128xf32>
    %16 = arith.addf %9, %15 : vector<64x128xf32>
    %cst_8 = arith.constant 0.797884583 : f32
    %17 = vector.broadcast %cst_8 : f32 to vector<64x128xf32>
    %18 = arith.mulf %17, %16 : vector<64x128xf32>
    %19 = math.tanh %18 : vector<64x128xf32>
    %cst_9 = arith.constant 1.000000e+00 : f32
    %20 = vector.broadcast %cst_9 : f32 to vector<64x128xf32>
    %21 = arith.addf %20, %19 : vector<64x128xf32>
    %22 = arith.mulf %11, %21 : vector<64x128xf32>
    %c0_10 = arith.constant 0 : index
    %c0_11 = arith.constant 0 : index
    %23 = vector.load %arg8[%c0_10, %c0_11] : memref<64x128xf32, #tpu.memory_space<vmem>>, vector<64x128xf32>
    %24 = arith.truncf %22 : vector<64x128xf32> to vector<64x128xbf16>
    %c0_12 = arith.constant 0 : index
    %c0_13 = arith.constant 0 : index
    %25 = vector.load %arg5[%c0_12, %c0_13] : memref<128x128xbf16, #tpu.memory_space<vmem>>, vector<128x128xbf16>
    %cst_14 = arith.constant dense<0.000000e+00> : vector<64x128xf32>
    %26 = tpu.matmul %24, %25, %cst_14 {dimension_numbers = #tpu.dot_dimension_numbers<[1], [0], [0], [1], [0, 0, 1, 1], [], []>} : vector<64x128xbf16>, vector<128x128xbf16>, vector<64x128xf32> -> vector<64x128xf32>
    %27 = arith.addf %23, %26 : vector<64x128xf32>
    %c0_15 = arith.constant 0 : index
    %c0_16 = arith.constant 0 : index
    %28 = vector.load %arg8[%c0_15, %c0_16] : memref<64x128xf32, #tpu.memory_space<vmem>>, vector<64x128xf32>
    tpu.vector_store %arg8[%c0_15, %c0_16], %27 {strides = array<i32>} : memref<64x128xf32, #tpu.memory_space<vmem>>, vector<64x128xf32>,
    %c1_i32 = arith.constant 1 : i32
    %29 = arith.cmpi eq, %arg1, %c1_i32 : i32
    %30 = arith.extui %29 : i1 to i32
    %c0_i32_17 = arith.constant 0 : i32
    %31 = arith.cmpi ne, %30, %c0_i32_17 : i32
    scf.if %31 {
      %c0_18 = arith.constant 0 : index
      %c0_19 = arith.constant 0 : index
      %32 = vector.load %arg8[%c0_18, %c0_19] : memref<64x128xf32, #tpu.memory_space<vmem>>, vector<64x128xf32>
      %c0_20 = arith.constant 0 : index
      %c0_21 = arith.constant 0 : index
      %33 = vector.load %arg6[%c0_20, %c0_21] : memref<1x128xf32, #tpu.memory_space<vmem>>, vector<1x128xf32>
      %34 = vector.broadcast %33 : vector<1x128xf32> to vector<64x128xf32>
      %35 = arith.addf %32, %34 : vector<64x128xf32>
      %c0_22 = arith.constant 0 : index
      %c0_23 = arith.constant 0 : index
      %36 = vector.load %arg7[%c0_22, %c0_23] : memref<64x128xf32, #tpu.memory_space<vmem>>, vector<64x128xf32>
      tpu.vector_store %arg7[%c0_22, %c0_23], %35 {strides = array<i32>} : memref<64x128xf32, #tpu.memory_space<vmem>>, vector<64x128xf32>,
    } else {
    }
    return
  }
  func.func @transform_0(%arg0: i32, %arg1: i32) -> (i32, i32) {
    %c0_i32 = arith.constant 0 : i32
    %c0_i32_0 = arith.constant 0 : i32
    return %arg0, %c0_i32 : i32, i32
  }
  func.func @transform_1(%arg0: i32, %arg1: i32) -> (i32, i32) {
    %c0_i32 = arith.constant 0 : i32
    %c0_i32_0 = arith.constant 0 : i32
    return %c0_i32, %arg1 : i32, i32
  }
  func.func @transform_2(%arg0: i32, %arg1: i32) -> (i32, i32) {
    %c0_i32 = arith.constant 0 : i32
    %c0_i32_0 = arith.constant 0 : i32
    return %c0_i32, %arg1 : i32, i32
  }
  func.func @transform_3(%arg0: i32, %arg1: i32) -> (i32, i32) {
    %c0_i32 = arith.constant 0 : i32
    %c0_i32_0 = arith.constant 0 : i32
    return %arg1, %c0_i32 : i32, i32
  }
  func.func @transform_4(%arg0: i32, %arg1: i32) -> (i32, i32) {
    %c0_i32 = arith.constant 0 : i32
    %c0_i32_0 = arith.constant 0 : i32
    %c0_i32_1 = arith.constant 0 : i32
    return %c0_i32, %c0_i32_0 : i32, i32
  }
  func.func @transform_5(%arg0: i32, %arg1: i32) -> (i32, i32) {
    %c0_i32 = arith.constant 0 : i32
    %c0_i32_0 = arith.constant 0 : i32
    return %arg0, %c0_i32 : i32, i32
  }
}

</mosaic_0001>

<bundles_post_ra>
// kernel: tpu_custom_call.1
= control target key start
LH: loop header
LB: loop body
LE: loop exit
PB: predicated region body
PF: predicated region fallthrough
CT: control target
= control target key end

     0   :  { %s1773_s0 = inlined_call_operand.hbm [shape: f32[128,128], index: 0, kind: input, shape index: {}]   ;;  %s1774_s1 = inlined_call_operand.hbm [shape: bf16[128,256], index: 1, kind: input, shape index: {}]   ;;  %s1775_s2 = inlined_call_operand.hbm [shape: f32[1,256], index: 2, kind: input, shape index: {}]   ;;  %s1776_s3 = inlined_call_operand.hbm [shape: bf16[256,128], index: 3, kind: input, shape index: {}]   ;;  %s1777_s4 = inlined_call_operand.vmem [shape: f32[1,128], index: 4, kind: input, shape index: {}]   ;;  %s1778_s5 = inlined_call_operand.hbm [shape: f32[128,128], index: 5, kind: output, shape index: {}]  }
   0x1   :  { %1796 = sst [smem:[#allocation28_spill]] %s1773_s0 }
   0x2   :  { %1797 = sst [smem:[#allocation29_spill]] %s1774_s1 }
   0x3   :  { %1798 = sst [smem:[#allocation30_spill]] %s1775_s2 }
   0x4   :  { %1799 = sst [smem:[#allocation31_spill]] %s1778_s5 }
   0x5   :  { %10 = vsyncpa [#allocation4], 0 }
   0x6   :  { %12 = vsyncpa [#allocation4 + $0x1], 0 }
   0x7   :  { %13 = vsyncpa [#allocation7], 0 }
   0x8   :  { %15 = vsyncpa [#allocation7 + $0x1], 0 }
   0x9   :  { %16 = vsyncpa [#allocation10], 0 }
   0xa   :  { %18 = vsyncpa [#allocation10 + $0x1], 0 }
   0xb   :  { %19 = vsyncpa [#allocation5], 0 }
   0xc   :  { %21 = vsyncpa [#allocation5 + $0x1], 0  ;;  %s1437_s18 = smov 0   ;;  %s1439_s19 = smov 0  }
   0xd   :  { %s1441_s20 = smov 0   ;;  %s1443_s21 = smov 0  }
   0xe   :  { %s1445_s22 = smov 0   ;;  %s1447_s23 = smov 0  }
   0xf   :  { %s1449_s24 = smov 0   ;;  %s1451_s25 = smov 0  }
  0x10   :  { %s1453_s26 = smov 0   ;;  %s1455_s27 = smov 0  }
  0x11   :  { %s1457_s28 = smov 0  }
  0x12 LB: > { %1800 = sst [smem:[#allocation16_spill]] %s1366_s20  ;;  %p54_p0 = scmp.eq.s32.totalorder %s1398_s28, 0  ;;  %s1398_s28 = sphi %s1457_s28, %s27_s28   ;;  %s1394_s27 = sphi %s1455_s27, %s1839_s27   ;;  %s1390_s26 = sphi %s1453_s26, %s1845_s26   ;;  %s1386_s25 = sphi %s1451_s25, %s1837_s25   ;;  %s1382_s24 = sphi %s1449_s24, %s1844_s24   ;;  %s1378_s23 = sphi %s1447_s23, %s1836_s23   ;;  %s1374_s22 = sphi %s1445_s22, %s1843_s22   ;;  %s1370_s21 = sphi %s1443_s21, %s1842_s21   ;;  %s1366_s20 = sphi %s1441_s20, %s1834_s20   ;;  %s1362_s19 = sphi %s1439_s19, %s1841_s19   ;;  %s1358_s18 = sphi %s1437_s18, %s1840_s18  }
  0x13   : > { %1801 = sst [smem:[#allocation17_spill]] %s1370_s21  ;;  %s72_s29 = sadd.s32 1, %s1366_s20 }
  0x14   : > { %1802 = sst [smem:[#allocation18_spill]] %s1378_s23  ;;  %p79_p1 = scmp.ne.s32.totalorder %s1366_s20, %s1362_s19 }
  0x15   : > { %1803 = sst [smem:[#allocation19_spill]] %s1386_s25  ;;  %p85_p2 = scmp.ne.s32.totalorder %s1362_s19, %s1358_s18 }
  0x16   : > { %1804 = sst [smem:[#allocation20_spill]] %s1394_s27  ;;  %p1784_p3 = scmp.lt.s32.totalorder %s1398_s28, 4 }
  0x17   : > { %1805 = sst [smem:[#allocation21_spill]] %s1398_s28  ;;  %p81_p4 = por %p79_p1, %p54_p0 }
  0x18   : > { %s233_s30 = sand.u32 1, %s1398_s28   ;;  %s1503_s6 = sand.u32 1, %s1366_s20  }
  0x19   : > { %s1779_s7 = sshll.u32 %s1503_s6, 6  ;;  %s891_s8 = sshll.u32 %s1390_s26, 2 }
  0x1a   : > { %s1806_s1 = sld [smem:[#allocation29_spill]]  ;;  %s237_s12 = scalar_lea.vmem [#allocation6], %s1779_s7 }
  0x1b   : > { %s244_s13 = sshll.u32 %s237_s12, 4  ;;  %p1514_p5 = pnand %p1784_p3, %p81_p4  ;;  %s245_s13 = int_to_ptr.vmem [resolvable:$true] %s244_s13 }
  0x1c   : > { %p895_p6 = scmp.ge.s32.totalorder %s1398_s28, 1  ;;  %s1519_s16 = scalar_lea.sflag [#allocation7], %s233_s30 }
  0x1d   : > { %s1782_s17 = smov 128   ;;  %s1781_s9 = smov 4  }
  0x1e   : > { %p291_p7 = scmp.lt.s32.totalorder %s1398_s28, 5  ;;  %s1533_s10 = sadd.s32 4294967295, %s1398_s28  }
  0x1f   : > { %s36_s12 = sadd.s32 1, %s1390_s26  ;;  %s39_s7 = sadd.s32 1, %s1394_s27 }
  0x20   : > { %s241_s11 = scalar_lea.hbm %s1806_s1, %s891_s8  ;;  %s1780_s8 = smov 64  }
  0x21   : > { %s242_s14 = sshll.u32 %s241_s11, 4  ;;  %p1528_p8 = pnand %p895_p6, %p291_p7  ;;  %s243_s14 = int_to_ptr.hbm [resolvable:$true] %s242_s14 }
  0x22   : > { %1022 = dma.hbm_to_vmem [thread:$0]  (!%p1514_p5), %s243_s14, 1024, %s245_s13, %s1519_s16, %s1782_s17, %s1780_s8, %s1781_s9  }
  0x23   : > { %s884_s11 = sadd.s32 4294967294, %s1398_s28   ;;  %p37_p9 = scmp.ge.s32.totalorder %s36_s12, 2 }
  0x24   : > { %s46_s13 = sadd.s32 1, %s1378_s23  ;;  %p53_p10 = scmp.ne.s32.totalorder %s1378_s23, %s1374_s22 }
  0x25   : > { %p59_p11 = scmp.ne.s32.totalorder %s1374_s22, %s1370_s21  ;;  %s1847_s12 = smov (%p37_p9, %s36_s12), 0 }
  0x26   : > { %1809 = sst [smem:[#allocation22_spill]] %s1847_s12  ;;  %s1849_s7 = smov (!%p37_p9, %s39_s7), %s1394_s27 }
  0x27   : > { %p1551_p12 = por %p54_p0, %p53_p10  ;;  %p60_p13 = scmp.eq.s32.totalorder %s1533_s10, 0 }
  0x28   : > { %p41_p1 = scmp.ge.s32.totalorder %s1849_s7, 2  ;;  %s69_s8 = ssub.s32 %s1390_s26, %s1847_s12 }
  0x29   : > { %p1561_p4 = por %p60_p13, %p59_p11  ;;  %p70_p6 = scmp.eq.s32.totalorder %s69_s8, 0 }
  0x2a   : > { %s1851_s7 = smov (%p41_p1, %s1849_s7), 0  ;;  %p1577_p0 = por %p85_p2, %p60_p13 }
  0x2b   : > { %1812 = sst [smem:[#allocation23_spill]] %s1851_s7  ;;  %s43_s1 = ssub.s32 %s1394_s27, %s1851_s7 }
  0x2c   : > { %s1570_s17 = scalar_select %p70_p6, %s1366_s20, %s72_s29  }
  0x2d   : > { %p44_p7 = scmp.eq.s32.totalorder %s43_s1, 0  ;;  %p182_p9 = scmp.eq.s32.totalorder %s1533_s10, 3 }
  0x2e   : > { %1813 = sst [smem:[#allocation24_spill]] %s1570_s17  ;;  %p188_p3 = scmp.eq.s32.totalorder %s884_s11, 3 }
  0x2f   : > { %s211_s12 = sand.u32 1, %s1378_s23   ;;  %p1589_p1 = por %p182_p9, %p53_p10 }
  0x30   : > { %s1584_s8 = scalar_select %p44_p7, %s1378_s23, %s46_s13  }
  0x31   : > { %s1816_s25 = scalar_select %p1589_p1, 1, 0 }
  0x32   : > { %1815 = sst [smem:[#allocation25_spill]] %s1584_s8  ;;  %p1596_p2 = por %p188_p3, %p59_p11 }
  0x33   : > { %1817 = sst [smem:[#allocation26_spill]] %s1816_s25  ;;  %s887_s29 = sshll.u32 %s211_s12, 6 }
  0x34   : > { %s1818_s18 = scalar_select %p1596_p2, 1, 0 }
  0x35   : > { %s971_s7 = sshll.u32 %s1394_s27, 6  ;;  %s1820_s0 = sld [smem:[#allocation28_spill]] }
  0x36   : > { %1819 = sst [smem:[#allocation27_spill]] %s1818_s18  ;;  %s215_s13 = scalar_lea.vmem [#allocation3], %s887_s29 }
  0x37   : > { %s223_s8 = sshll.u32 %s215_s13, 4  ;;  %p1821_p3 = scmp.lt.s32.totalorder %s1398_s28, 4  ;;  %s224_s8 = int_to_ptr.vmem [resolvable:$true] %s223_s8 }
  0x38   : > { %s1822_s2 = sld [smem:[#allocation30_spill]]  ;;  %s212_s21 = scalar_lea.sflag [#allocation4], %s211_s12 }
  0x39   : > { %p1017_p10 = pnand %p1821_p3, %p1551_p12  ;;  %s1403_s17 = smov 8  }
  0x3a   : > { %s257_s1 = scalar_lea.vmem [#allocation8], %s1503_s6  ;;  %s972_s14 = sshll.u32 %s1390_s26, 6 }
  0x3b   : > { %s220_s11 = scalar_lea.hbm %s1820_s0, %s971_s7  ;;  %s1823_s7 = smov 128  }
  0x3c   : > { %s221_s23 = sshll.u32 %s220_s11, 4  ;;  %s264_s13 = sshll.u32 %s257_s1, 4  ;;  %s222_s23 = int_to_ptr.hbm [resolvable:$true] %s221_s23  ;;  %s265_s13 = int_to_ptr.vmem [resolvable:$true] %s264_s13 }
  0x3d   : > { %1019 = dma.hbm_to_vmem [thread:$0]  (!%p1017_p10), %s222_s23, 1024, %s224_s8, %s212_s21, %s1823_s7, %s1823_s7, %s1403_s17  }
  0x3e   : > { %s260_s27 = scalar_lea.hbm %s1822_s2, %s1390_s26  ;;  %s1824_s11 = sshll.u32 %s1503_s6, 6 }
  0x3f   : > { %s262_s29 = sshll.u32 %s260_s27, 4  ;;  %s275_s0 = scalar_lea.vmem [#allocation9], %s1824_s11  ;;  %s263_s29 = int_to_ptr.hbm [resolvable:$true] %s262_s29 }
  0x40   : > { %1025 = dma.hbm_to_vmem [thread:$0]  (!%p1514_p5), %s263_s29, 16, %s265_s13, %s1519_s16  }
  0x41   : > { %s283_s28 = sshll.u32 %s275_s0, 4  ;;  %s280_s12 = scalar_lea.hbm %s1776_s3, %s972_s14  ;;  %s284_s28 = int_to_ptr.vmem [resolvable:$true] %s283_s28 }
  0x42   : > { %s281_s2 = sshll.u32 %s280_s12, 4  ;;  %s272_s25 = scalar_lea.sflag [#allocation10], %s1503_s6  ;;  %s282_s2 = int_to_ptr.hbm [resolvable:$true] %s281_s2 }
  0x43   : > { %s1825_s21 = smov 4   ;;  %s1826_s23 = smov 64  }
  0x44   : > { %1028 = dma.hbm_to_vmem [thread:$0]  (!%p1514_p5), %s282_s2, 1024, %s284_s28, %s272_s25, %s1826_s23, %s1826_s23, %s1825_s21  }
  0x45   : > { %295 = sbr.rel (%p1528_p8) target bundleno = 487 (0x1e7), region = 40  ;;  %s1633_s27 = sand.u32 (!%p1528_p8), 1, %s1374_s22  }
  0x46   : > { %s896_s0 = sshll.u32 (!%p1528_p8), %s1633_s27, 6  ;;  %s298_s16 = scalar_lea.sflag (!%p1528_p8), [#allocation4], %s1633_s27 }
  0x47   : > { %s1637_s8 = scalar_lea.vmem (!%p1528_p8), [#allocation3], %s896_s0 }
  0x4a   : > { %1341 = dma.done.wait (%p1561_p4), %s298_s16, 1024  }
  0x4b   : > { %1343 = vsyncadd (%p1561_p4), %s298_s16, 4294966272  ;;  %s307_s2 = sand.u32 1, %s1533_s10   ;;  %s1645_s25 = sand.u32 1, %s1362_s19  }
  0x4c   : > { %s897_s28 = sshll.u32 %s1645_s25, 6  ;;  %s308_s6 = scalar_lea.sflag [#allocation7], %s307_s2 }
  0x4d   : > { %s1648_s15 = scalar_lea.vmem [#allocation6], %s897_s28 }
  0x4e   : > { %1345 = dma.done.wait (%p1577_p0), %s308_s6, 1040  }
  0x4f   : > { %1347 = vsyncadd (%p1577_p0), %s308_s6, 4294966256  ;;  %s320_s9 = scalar_lea.vmem [#allocation8], %s1645_s25  ;;  %s327_s30 = scalar_lea.sflag [#allocation10], %s1645_s25 }
  0x50   : > { %s1656_s17 = scalar_lea.vmem [#allocation9], %s897_s28 }
  0x51   : > { %1349 = dma.done.wait (%p1577_p0), %s327_s30, 1024  }
  0x52   : > { %1351 = vsyncadd (%p1577_p0), %s327_s30, 4294966272  ;;  %s1662_s10 = scalar_lea.vmem [#allocation11], %s896_s0  ;;  %p900_p5 = scmp.ne.s32.totalorder %s1382_s24, 0 }
  0x54   : > { %378 = sbr.rel (%p900_p5) target bundleno = 98 (0x62), region = 60 }
  0x59   : > { %v1404_v0 = vmov 0.0  }
  0x5a   : > { %379 = vst [vmem:[#allocation2 + $0x30] sm:$0xff] %v1404_v0 }
  0x5b   : > { %380 = vst [vmem:[#allocation2] sm:$0xff] %v1404_v0 }
  0x5c   : > { %381 = vst [vmem:[#allocation2 + $0x18] sm:$0xff] %v1404_v0 }
  0x5d   : > { %382 = vst [vmem:[#allocation2 + $0x10] sm:$0xff] %v1404_v0 }
  0x5e   : > { %383 = vst [vmem:[#allocation2 + $0x8] sm:$0xff] %v1404_v0 }
  0x5f   : > { %384 = vst [vmem:[#allocation2 + $0x20] sm:$0xff] %v1404_v0 }
  0x60   : > { %385 = vst [vmem:[#allocation2 + $0x28] sm:$0xff] %v1404_v0 }
  0x61   : > { %386 = vst [vmem:[#allocation2 + $0x38] sm:$0xff] %v1404_v0 }
  0x62 PF: > { %v980_v1 = vld [vmem:[%s1648_s15 + $0x38] sm:$0xff]  ;;  %v979_v2 = vld [vmem:[%s1648_s15 + $0x30] sm:$0xff]  ;;  %v978_v3 = vld [vmem:[%s1648_s15 + $0x28] sm:$0xff]  ;;  %p965_p8 = scmp.ne.s32.totalorder %s1382_s24, 1 }
  0x63   : > { %467 = vmatpush.bf16.msra.mxu0 %v980_v1  ;;  %990 = vmatpush.bf16.msra.mxu2 %v980_v1  ;;  %v977_v4 = vld [vmem:[%s1648_s15 + $0x20] sm:$0xff]  ;;  %v976_v5 = vld [vmem:[%s1648_s15 + $0x18] sm:$0xff]  ;;  %v975_v6 = vld [vmem:[%s1648_s15 + $0x10] sm:$0xff] }
  0x64   : > { %v974_v7 = vld [vmem:[%s1648_s15 + $0x8] sm:$0xff]  ;;  %v973_v8 = vld [vmem:[%s1648_s15] sm:$0xff]  ;;  %v389_v15 = vld [vmem:[%s1637_s8 + $0x10] sm:$0xff] }
  0x65   : > { %v387_v9 = vld [vmem:[%s1637_s8] sm:$0xff]  ;;  %v388_v10 = vld [vmem:[%s1637_s8 + $0x8] sm:$0xff]  ;;  %v390_v16 = vld [vmem:[%s1637_s8 + $0x18] sm:$0xff] }
  0x66   : > { %v391_v11 = vld [vmem:[%s1637_s8 + $0x20] sm:$0xff]  ;;  %v392_v12 = vld [vmem:[%s1637_s8 + $0x28] sm:$0xff]  ;;  %v395_v13 = vpack.c.bf16 %v388_v10, %v387_v9  ;;  %v393_v17 = vld [vmem:[%s1637_s8 + $0x30] sm:$0xff]  ;;  %v396_v19 = vpack.c.bf16 %v390_v16, %v389_v15 }
  0x67   : > { %468 = vmatpush.bf16.msra.mxu0 %v979_v2  ;;  %991 = vmatpush.bf16.msra.mxu2 %v979_v2  ;;  %v397_v14 = vpack.c.bf16 %v392_v12, %v391_v11  ;;  %v394_v18 = vld [vmem:[%s1637_s8 + $0x38] sm:$0xff]  ;;  %v986_v23 = vld [vmem:[%s1656_s17 + $0x28] sm:$0xff]  ;;  %v985_v24 = vld [vmem:[%s1656_s17 + $0x20] sm:$0xff] }
  0x68   : > { %v398_v20 = vpack.c.bf16 %v394_v18, %v393_v17  ;;  %v988_v21 = vld [vmem:[%s1656_s17 + $0x38] sm:$0xff]  ;;  %v987_v22 = vld [vmem:[%s1656_s17 + $0x30] sm:$0xff]  ;;  %v982_v27 = vld [vmem:[%s1656_s17 + $0x8] sm:$0xff] }
  0x69   : > { %644 = vmatpush.bf16.msra.mxu1 %v988_v21  ;;  %998 = vmatpush.bf16.msra.mxu3 %v988_v21  ;;  %v984_v25 = vld [vmem:[%s1656_s17 + $0x18] sm:$0xff]  ;;  %v983_v26 = vld [vmem:[%s1656_s17 + $0x10] sm:$0xff]  ;;  %v981_v29 = vld [vmem:[%s1656_s17] sm:$0xff] }
  0x6a   : > { %v1690_v28 = vld [vmem:[%s320_s9] ss:$0 sm:$0xff] }
  0x6b   : > { %469 = vmatpush.bf16.msra.mxu0 %v978_v3  ;;  %992 = vmatpush.bf16.msra.mxu2 %v978_v3 }
  0x6d   : > { %645 = vmatpush.bf16.msra.mxu1 %v987_v22  ;;  %999 = vmatpush.bf16.msra.mxu3 %v987_v22 }
  0x6f   : > { %470 = vmatpush.bf16.msra.mxu0 %v977_v4  ;;  %993 = vmatpush.bf16.msra.mxu2 %v977_v4 }
  0x71   : > { %646 = vmatpush.bf16.msra.mxu1 %v986_v23  ;;  %1000 = vmatpush.bf16.msra.mxu3 %v986_v23 }
  0x73   : > { %471 = vmatpush.bf16.msra.mxu0 %v976_v5  ;;  %994 = vmatpush.bf16.msra.mxu2 %v976_v5 }
  0x75   : > { %647 = vmatpush.bf16.msra.mxu1 %v985_v24  ;;  %1001 = vmatpush.bf16.msra.mxu3 %v985_v24 }
  0x77   : > { %472 = vmatpush.bf16.msra.mxu0 %v975_v6  ;;  %995 = vmatpush.bf16.msra.mxu2 %v975_v6 }
  0x79   : > { %648 = vmatpush.bf16.msra.mxu1 %v984_v25  ;;  %1002 = vmatpush.bf16.msra.mxu3 %v984_v25 }
  0x7b   : > { %473 = vmatpush.bf16.msra.mxu0 %v974_v7  ;;  %996 = vmatpush.bf16.msra.mxu2 %v974_v7 }
  0x7d   : > { %649 = vmatpush.bf16.msra.mxu1 %v983_v26  ;;  %1003 = vmatpush.bf16.msra.mxu3 %v983_v26 }
  0x7f   : > { %474 = vmatpush.bf16.msra.mxu0 %v973_v8  ;;  %997 = vmatpush.bf16.msra.mxu2 %v973_v8 }
  0x81   : > { %650 = vmatpush.bf16.msra.mxu1 %v982_v27  ;;  %1004 = vmatpush.bf16.msra.mxu3 %v982_v27 }
  0x82   : > { %475 = vmatmul.bf16.vlgmr.msra.gmra.mxu0 %v395_v13  ;;  %485 = vmatmul.bf16.vlgmr.msra.gmra.mxu2 %v397_v14 }
  0x85   : > { %651 = vmatpush.bf16.msra.mxu1 %v981_v29  ;;  %1005 = vmatpush.bf16.msra.mxu3 %v981_v29 }
  0x92   : > { %480 = vmatmul.bf16.gmra.mxu0 %v396_v19  ;;  %490 = vmatmul.bf16.gmra.mxu2 %v398_v20 }
  0xff   : > { %v476_v30 = vpop.f32.mrf.mxu0 }
 0x100   : > { %v477_v31 = vadd.f32 %v1690_v28, %v476_v30 }
 0x102   : > { %v504_v32 = vmul.f32 %v477_v31, %v477_v31  ;;  %v496_v10 = vmul.f32 0.5, %v477_v31 }
 0x104   : > { %v512_v33 = vmul.f32 %v504_v32, %v477_v31 }
 0x105   : > { %v486_v34 = vpop.f32.mrf.mxu2 }
 0x106   : > { %v520_v35 = vmul.f32 0.044715, %v512_v33  ;;  %v487_v36 = vadd.f32 %v1690_v28, %v486_v34 }
 0x107   : > { %v478_v37 = vpop.f32.mrf.mxu0 }
 0x108   : > { %v508_v38 = vmul.f32 %v487_v36, %v487_v36  ;;  %v479_v39 = vadd.f32 %v1690_v28, %v478_v37  ;;  %v528_v40 = vadd.f32 %v520_v35, %v477_v31  ;;  %v500_v29 = vmul.f32 0.5, %v487_v36 }
 0x10a   : > { %v516_v41 = vmul.f32 %v508_v38, %v487_v36  ;;  %v505_v42 = vmul.f32 %v479_v39, %v479_v39  ;;  %v536_v45 = vmul.f32 0.7978846, %v528_v40  ;;  %v497_v11 = vmul.f32 0.5, %v479_v39 }
 0x10c   : > { %v524_v43 = vmul.f32 0.044715, %v516_v41  ;;  %v513_v44 = vmul.f32 %v505_v42, %v479_v39  ;;  %1131 = vtanh.f32 %v536_v45 }
 0x10d   : > { %v488_v46 = vpop.f32.mrf.mxu2 }
 0x10e   : > { %v521_v47 = vmul.f32 0.044715, %v513_v44  ;;  %v489_v48 = vadd.f32 %v1690_v28, %v488_v46  ;;  %v532_v49 = vadd.f32 %v524_v43, %v487_v36 }
 0x10f   : > { %v481_v50 = vpop.f32.mrf.mxu0 }
 0x110   : > { %v509_v51 = vmul.f32 %v489_v48, %v489_v48  ;;  %v1698_v52 = vadd.f32 %v1690_v28, %v481_v50  ;;  %v529_v53 = vadd.f32 %v521_v47, %v479_v39  ;;  %v540_v57 = vmul.f32 0.7978846, %v532_v49 }
 0x111   : > { %v501_v30 = vmul.f32 0.5, %v489_v48 }
 0x112   : > { %v517_v54 = vmul.f32 %v509_v51, %v489_v48  ;;  %v506_v55 = vmul.f32 %v1698_v52, %v1698_v52  ;;  %v537_v56 = vmul.f32 0.7978846, %v529_v53  ;;  %v1132_v61 = vpop.eup %1131  ;;  %v498_v36 = vmul.f32 0.5, %v1698_v52 }
 0x113   : > { %v552_v6 = vadd.f32 1.0, %v1132_v61 }
 0x114   : > { %v525_v58 = vmul.f32 0.044715, %v517_v54  ;;  %v514_v59 = vmul.f32 %v506_v55, %v1698_v52  ;;  %1133 = vtanh.f32 %v537_v56 }
 0x115   : > { %v491_v60 = vpop.f32.mrf.mxu2  ;;  %1135 = vtanh.f32 %v540_v57  ;;  %v560_v18 = vmul.f32 %v552_v6, %v496_v10  ;;  %v573_v6 = vld [vmem:[#allocation2 + $0x20] sm:$0xff] }
 0x116   : > { %v522_v62 = vmul.f32 0.044715, %v514_v59  ;;  %v492_v63 = vadd.f32 %v1690_v28, %v491_v60  ;;  %v533_v0 = vadd.f32 %v525_v58, %v489_v48  ;;  %v568_v59 = vld [vmem:[#allocation2 + $0x30] sm:$0xff] }
 0x117   : > { %v483_v1 = vpop.f32.mrf.mxu0 }
 0x118   : > { %v510_v2 = vmul.f32 %v492_v63, %v492_v63  ;;  %v484_v3 = vadd.f32 %v1690_v28, %v483_v1  ;;  %v541_v4 = vmul.f32 0.7978846, %v533_v0  ;;  %v530_v5 = vadd.f32 %v522_v62, %v1698_v52  ;;  %v569_v52 = vld [vmem:[#allocation2] sm:$0xff]  ;;  %v572_v1 = vld [vmem:[#allocation2 + $0x8] sm:$0xff] }
 0x119   : > { %v502_v53 = vmul.f32 0.5, %v492_v63 }
 0x11a   : > { %v1134_v7 = vpop.eup %1133  ;;  %v518_v8 = vmul.f32 %v510_v2, %v492_v63  ;;  %v507_v9 = vmul.f32 %v484_v3, %v484_v3  ;;  %1137 = vtanh.f32 %v541_v4  ;;  %v538_v16 = vmul.f32 0.7978846, %v530_v5  ;;  %v570_v4 = vld [vmem:[#allocation2 + $0x18] sm:$0xff] }
 0x11b   : > { %v553_v12 = vadd.f32 1.0, %v1134_v7  ;;  %v1136_v13 = vpop.eup %1135  ;;  %v499_v44 = vmul.f32 0.5, %v484_v3 }
 0x11c   : > { %v526_v14 = vmul.f32 0.044715, %v518_v8  ;;  %v515_v15 = vmul.f32 %v507_v9, %v484_v3  ;;  %v556_v24 = vadd.f32 1.0, %v1136_v13  ;;  %1139 = vtanh.f32 %v538_v16  ;;  %v571_v9 = vld [vmem:[#allocation2 + $0x10] sm:$0xff] }
 0x11d   : > { %v493_v17 = vpop.f32.mrf.mxu2  ;;  %v561_v19 = vmul.f32 %v553_v12, %v497_v11  ;;  %v574_v12 = vld [vmem:[#allocation2 + $0x28] sm:$0xff] }
 0x11e   : > { %v523_v20 = vmul.f32 0.044715, %v515_v15  ;;  %v494_v21 = vadd.f32 %v1690_v28, %v493_v17  ;;  %v534_v22 = vadd.f32 %v526_v14, %v492_v63  ;;  %v564_v35 = vmul.f32 %v556_v24, %v500_v29  ;;  %v575_v15 = vld [vmem:[#allocation2 + $0x38] sm:$0xff] }
 0x11f   : > { %v576_v23 = vpack.c.bf16 %v561_v19, %v560_v18 }
 0x120   : > { %v1138_v25 = vpop.eup %1137  ;;  %v511_v26 = vmul.f32 %v494_v21, %v494_v21  ;;  %v531_v27 = vadd.f32 %v523_v20, %v484_v3  ;;  %v542_v34 = vmul.f32 0.7978846, %v534_v22  ;;  %v503_v54 = vmul.f32 0.5, %v494_v21 }
 0x121   : > { %652 = vmatmul.bf16.vlgmr.msra.gmra.mxu1 %v576_v23  ;;  %v557_v31 = vadd.f32 1.0, %v1138_v25 }
 0x122   : > { %v519_v32 = vmul.f32 %v511_v26, %v494_v21  ;;  %v539_v33 = vmul.f32 0.7978846, %v531_v27  ;;  %v1140_v28 = vpop.eup %1139 }
 0x123   : > { %v565_v37 = vmul.f32 %v557_v31, %v501_v30  ;;  %v554_v42 = vadd.f32 1.0, %v1140_v28 }
 0x124   : > { %v527_v38 = vmul.f32 0.044715, %v519_v32  ;;  %1141 = vtanh.f32 %v539_v33 }
 0x125   : > { %v578_v39 = vpack.c.bf16 %v565_v37, %v564_v35  ;;  %1143 = vtanh.f32 %v542_v34  ;;  %v562_v47 = vmul.f32 %v554_v42, %v498_v36 }
 0x126   : > { %v535_v40 = vadd.f32 %v527_v38, %v494_v21 }
 0x127   : > { %662 = vmatmul.bf16.vlgmr.msra.gmra.mxu3 %v578_v39 }
 0x128   : > { %v543_v41 = vmul.f32 0.7978846, %v535_v40 }
 0x12a   : > { %v1142_v43 = vpop.eup %1141  ;;  %1145 = vtanh.f32 %v543_v41 }
 0x12b   : > { %v555_v45 = vadd.f32 1.0, %v1142_v43  ;;  %v1144_v46 = vpop.eup %1143 }
 0x12c   : > { %v558_v50 = vadd.f32 1.0, %v1144_v46 }
 0x12d   : > { %v563_v48 = vmul.f32 %v555_v45, %v499_v44 }
 0x12e   : > { %v566_v56 = vmul.f32 %v558_v50, %v502_v53 }
 0x12f   : > { %v577_v49 = vpack.c.bf16 %v563_v48, %v562_v47 }
 0x130   : > { %v1146_v51 = vpop.eup %1145 }
 0x131   : > { %657 = vmatmul.bf16.gmra.mxu1 %v577_v49  ;;  %v559_v55 = vadd.f32 1.0, %v1146_v51 }
 0x133   : > { %v567_v57 = vmul.f32 %v559_v55, %v503_v54 }
 0x135   : > { %v579_v58 = vpack.c.bf16 %v567_v57, %v566_v56 }
 0x137   : > { %667 = vmatmul.bf16.gmra.mxu3 %v579_v58 }
 0x19e   : > { %v653_v60 = vpop.f32.mrf.mxu1 }
 0x19f   : > { %v673_v61 = vadd.f32 %v653_v60, %v568_v59 }
 0x1a1   : > { %681 = vst [vmem:[#allocation2 + $0x30] sm:$0xff] %v673_v61 }
 0x1a6   : > { %v655_v62 = vpop.f32.mrf.mxu1 }
 0x1a7   : > { %v674_v0 = vadd.f32 %v655_v62, %v569_v52 }
 0x1a9   : > { %682 = vst [vmem:[#allocation2] sm:$0xff] %v674_v0 }
 0x1aa   : > { %v663_v2 = vpop.f32.mrf.mxu3 }
 0x1ab   : > { %v677_v3 = vadd.f32 %v663_v2, %v572_v1 }
 0x1ad   : > { %685 = vst [vmem:[#allocation2 + $0x8] sm:$0xff] %v677_v3 }
 0x1ae   : > { %v658_v63 = vpop.f32.mrf.mxu1 }
 0x1af   : > { %v675_v5 = vadd.f32 %v658_v63, %v570_v4 }
 0x1b1   : > { %683 = vst [vmem:[#allocation2 + $0x18] sm:$0xff] %v675_v5 }
 0x1b2   : > { %v665_v7 = vpop.f32.mrf.mxu3 }
 0x1b3   : > { %v678_v8 = vadd.f32 %v665_v7, %v573_v6 }
 0x1b5   : > { %686 = vst [vmem:[#allocation2 + $0x20] sm:$0xff] %v678_v8 }
 0x1b6   : > { %v660_v10 = vpop.f32.mrf.mxu1 }
 0x1b7   : > { %v676_v11 = vadd.f32 %v660_v10, %v571_v9 }
 0x1b9   : > { %684 = vst [vmem:[#allocation2 + $0x10] sm:$0xff] %v676_v11 }
 0x1ba   : > { %v668_v13 = vpop.f32.mrf.mxu3 }
 0x1bb   : > { %v679_v14 = vadd.f32 %v668_v13, %v574_v12 }
 0x1bd   : > { %687 = vst [vmem:[#allocation2 + $0x28] sm:$0xff] %v679_v14 }
 0x1c1   : > { %692 = sbr.rel (%p965_p8) target bundleno = 465 (0x1d1), region = 64 }
 0x1c2   : > { %v670_v16 = vpop.f32.mrf.mxu3 }
 0x1c3   : > { %v680_v17 = vadd.f32 %v670_v16, %v575_v15 }
 0x1c5   : > { %688 = vst [vmem:[#allocation2 + $0x38] sm:$0xff] %v680_v17 }
 0x1c6   : > { %v693_v18 = vld [vmem:[#allocation2 + $0x30] sm:$0xff]  ;;  %v1147_v19 = vld [vmem:[%s1777_s4] ss:$0 sm:$0xff]  ;;  %v695_v21 = vld [vmem:[#allocation2 + $0x18] sm:$0xff] }
 0x1c7   : > { %v694_v20 = vld [vmem:[#allocation2] sm:$0xff]  ;;  %v696_v22 = vld [vmem:[#allocation2 + $0x10] sm:$0xff]  ;;  %v705_v23 = vadd.f32 %v1147_v19, %v693_v18  ;;  %v707_v25 = vadd.f32 %v1147_v19, %v695_v21  ;;  %v697_v26 = vld [vmem:[#allocation2 + $0x8] sm:$0xff] }
 0x1c8   : > { %v706_v24 = vadd.f32 %v1147_v19, %v694_v20  ;;  %v698_v27 = vld [vmem:[#allocation2 + $0x20] sm:$0xff]  ;;  %v708_v29 = vadd.f32 %v1147_v19, %v696_v22  ;;  %v699_v30 = vld [vmem:[#allocation2 + $0x28] sm:$0xff]  ;;  %v709_v31 = vadd.f32 %v1147_v19, %v697_v26 }
 0x1c9   : > { %713 = vst [vmem:[%s1662_s10] sm:$0xff] %v705_v23  ;;  %v710_v33 = vadd.f32 %v1147_v19, %v698_v27  ;;  %v711_v34 = vadd.f32 %v1147_v19, %v699_v30 }
 0x1ca   : > { %714 = vst [vmem:[%s1662_s10 + $0x8] sm:$0xff] %v706_v24 }
 0x1cb   : > { %715 = vst [vmem:[%s1662_s10 + $0x10] sm:$0xff] %v707_v25 }
 0x1cc   : > { %v700_v32 = vld [vmem:[#allocation2 + $0x38] sm:$0xff]  ;;  %716 = vst [vmem:[%s1662_s10 + $0x18] sm:$0xff] %v708_v29 }
 0x1cd   : > { %v712_v35 = vadd.f32 %v1147_v19, %v700_v32  ;;  %717 = vst [vmem:[%s1662_s10 + $0x20] sm:$0xff] %v709_v31 }
 0x1ce   : > { %718 = vst [vmem:[%s1662_s10 + $0x28] sm:$0xff] %v710_v33 }
 0x1cf   : > { %719 = vst [vmem:[%s1662_s10 + $0x30] sm:$0xff] %v711_v34 }
 0x1d0   : > { %720 = vst [vmem:[%s1662_s10 + $0x38] sm:$0xff] %v712_v35 }
 0x1d1 PF: > { %s1827_s24 = sld [smem:[#allocation19_spill]]  ;;  %s734_s18 = sshll.u32 %s1662_s10, 4  ;;  %s735_s18 = int_to_ptr.vmem [resolvable:$true] %s734_s18 }
 0x1d2   : > { %s1829_s11 = sld [smem:[#allocation31_spill]]  ;;  %s722_s21 = scalar_lea.sflag [#allocation5], %s1633_s27 }
 0x1d7   : > { %s989_s1 = sshll.u32 %s1827_s24, 6 }
 0x1d8   : > { %s733_s20 = scalar_lea.hbm %s1829_s11, %s989_s1  ;;  %s1288_s2 = scalar_lea.hbm %s1829_s11, 128 }
 0x1d9   : > { %s736_s12 = sshll.u32 %s733_s20, 4  ;;  %s737_s12 = int_to_ptr.hbm [resolvable:$true] %s736_s12 }
 0x1da   : > { %s1282_s23 = sshra.s32 %s737_s12, 4  ;;  %s1283_s23 = int_to_ptr.hbm [resolvable:$true] %s1282_s23 }
 0x1db   : > { %s1284_s0 = scalar_lea.hbm %s1283_s23, 64  ;;  %p1289_p4 = scmp.lt.s32.totalorder %s1283_s23, %s1829_s11 }
 0x1dc   : > { %p1285_p11 = scmp.ne.s32.totalorder %s1283_s23, %s1284_s0  ;;  %p1290_p6 = scmp.lt.s32.totalorder %s1288_s2, %s1284_s0 }
 0x1de   : > { %p1286_p12 = pnand %p1285_p11, %p1589_p1  ;;  %p1291_p0 = por %p1290_p6, %p1289_p4 }
 0x1e0   : > { %p1287_p13 = pneg %p1286_p12 }
 0x1e2   : > { %p1292_p7 = pnand %p1291_p0, %p1287_p13 }
 0x1e4   : > { %1295 = shalt.err (!%p1292_p7)
}
 0x1e5   : > { %s1405_s27 = smov 128   ;;  %s1406_s6 = smov 8  }
 0x1e6   : > { %1014 = dma.vmem_to_hbm [thread:$0]  (%p1589_p1), %s735_s18, 1024, %s737_s12, %s722_s21, %s1405_s27, %s1405_s27, %s1406_s6  }
 0x1e7 PF: > { %s1830_s15 = sld [smem:[#allocation21_spill]] }
 0x1e8   : > { %s1831_s9 = sld [smem:[#allocation17_spill]] }
 0x1ed   : > { %p1034_p9 = scmp.ge.s32.totalorder %s1830_s15, 2 }
 0x1ee   : > { %s751_s17 = sand.u32 1, %s1831_s9  }
 0x1ef   : > { %p1030_p3 = pnand %p1034_p9, %p1596_p2  ;;  %s752_s10 = scalar_lea.sflag [#allocation5], %s751_s17 }
 0x1f1   : > { %p1031_p10 = pneg %p1030_p3 }
 0x1f3   : > { %1353 = dma.done.wait (%p1031_p10), %s752_s10, 1024  }
 0x1f4   : > { %1355 = vsyncadd (%p1031_p10), %s752_s10, 4294966272  ;;  %s27_s28 = sadd.s32 1, %s1830_s15   ;;  %s1833_s5 = sld [smem:[#allocation16_spill]] }
 0x1f5   : > { %p24_p5 = scmp.ge.s32.totalorder %s27_s28, 6   ;;  %s1834_s20 = sld [smem:[#allocation24_spill]] }
 0x1f6   : > { %s1835_s7 = sld [smem:[#allocation18_spill]]  ;;  %s1840_s18 = smov %s1362_s19 }
 0x1f7   : > { %s1836_s23 = sld [smem:[#allocation25_spill]]  ;;  %s1842_s21 = smov %s1374_s22 }
 0x1f8   : > { %s1837_s25 = sld [smem:[#allocation20_spill]]  ;;  %s1844_s24 = smov %s1390_s26 }
 0x1f9   : > { %s1838_s29 = sld [smem:[#allocation22_spill]] }
 0x1fa   : > { %s1839_s27 = sld [smem:[#allocation23_spill]]  ;;  %s1841_s19 = smov %s1833_s5 }
 0x1fb   :  { %26 = sbr.rel (!%p24_p5) target bundleno = 18 (0x12), region = 130 }
 0x1fc   : > { %s1843_s22 = smov %s1835_s7 }
 0x1ff   : > { %s1845_s26 = smov %s1838_s29 }
 0x200   :  { %758 = vsyncpa [#allocation4], 1 }
 0x201   :  { %760 = vsyncpa [#allocation4 + $0x1], 1 }
 0x202   :  { %761 = vsyncpa [#allocation7], 1 }
 0x203   :  { %763 = vsyncpa [#allocation7 + $0x1], 1 }
 0x204   :  { %764 = vsyncpa [#allocation10], 1 }
 0x205   :  { %766 = vsyncpa [#allocation10 + $0x1], 1 }
 0x206   :  { %767 = vsyncpa [#allocation5], 1 }
 0x207   :  { %769 = vsyncpa [#allocation5 + $0x1], 1 }

</bundles_post_ra>
